<compile_context>
chip_gen: v7x
topology: tpu7x:2x2x1
jax: 0.10.0
libtpu: 0.0.40
codegen_flags: <defaults>
</compile_context>

<pallas_src>
import jax
import jax.numpy as jnp
from jax.experimental import pallas as pl
from jax.experimental.pallas import tpu as pltpu

FOLD = 8  # batch rows folded into the lane dim (== f32 sublane count)


def rma_diff_kernel(x_ref, wc_ref, bc_ref, out_ref):
    """Collapsed Classifier: logits = x @ Wc + bc (f32 accumulation)."""
    logits = jnp.dot(x_ref[...], wc_ref[...],
                     preferred_element_type=jnp.float32)
    out_ref[...] = (logits + bc_ref[...]).astype(out_ref.dtype)


def _round_up(x, m):
    return (x + m - 1) // m * m


def rma_diff_forward(membership, w1, b1, w2, b2, w3, b3, *, block_rows=2048):
    """Runs the (collapsed) Classifier as a tiled Pallas kernel.

    membership: (B, C) float32 — output of rm_aggnet (membership tensor).
    Weights are (in, out); biases are (1, out).
    """
    B, C = membership.shape
    N = w3.shape[1]

    # --- collapse the activation-free MLP into one affine map (tiny, in JAX)
    wc = w1 @ w2 @ w3                       # (C, N)
    bc = (b1 @ w2 + b2) @ w3 + b3           # (1, N)

    # --- fold FOLD batch rows into the lane dimension (lane-dense I/O) -----
    #   x  : (B, C)      -> (rows, FOLD*C)   (row-major reshape, no copy)
    #   Wc : (C, N)      -> block-diag (FOLD*C, FOLD*N)
    #   bc : (1, N)      -> (1, FOLD*N)
    rows_raw = -(-B // FOLD)
    if rows_raw <= block_rows:
        tb = rows_raw                        # single block == full dim: legal
        rows = rows_raw
    else:
        tb = _round_up(block_rows, 8)        # (8,128) block constraint
        rows = _round_up(rows_raw, tb)       # grid divides evenly
    b_pad = rows * FOLD

    x = membership
    if b_pad != B:                           # only copies when padding needed
        x = jnp.pad(x, ((0, b_pad - B), (0, 0)))
    x2 = x.reshape(rows, FOLD * C)

    wbig = jnp.kron(jnp.eye(FOLD, dtype=wc.dtype), wc)   # (FOLD*C, FOLD*N)
    bbig = jnp.tile(bc, (1, FOLD))                        # (1, FOLD*N)

    out2 = pl.pallas_call(
        rma_diff_kernel,
        out_shape=jax.ShapeDtypeStruct((rows, FOLD * N), jnp.float32),
        grid_spec=pltpu.PrefetchScalarGridSpec(
            num_scalar_prefetch=0,
            grid=(rows // tb,),
            in_specs=[
                # x: tiled over (folded) batch, double-buffered.
                pl.BlockSpec((tb, FOLD * C), lambda i: (i, 0)),
                # collapsed weight / bias: constant index_map -> VMEM-resident.
                pl.BlockSpec((FOLD * C, FOLD * N), lambda i: (0, 0)),
                pl.BlockSpec((1, FOLD * N), lambda i: (0, 0)),
            ],
            out_specs=pl.BlockSpec((tb, FOLD * N), lambda i: (i, 0)),
        ),
        compiler_params=pltpu.CompilerParams(
            dimension_semantics=("parallel",),
        ),
    )(x2, wbig, bbig)

    # Unfold lanes back to batch rows; strip batch padding.
    return out2.reshape(b_pad, N)[:B]


def init_params(key, codeword_length, num_classes):
    """Deterministic parameter init for the Classifier (synthetic weights)."""
    k1, k2, k3, k4, k5, k6 = jax.random.split(key, 6)
    w1 = jax.random.normal(k1, (codeword_length, 32), jnp.float32) * 0.1
    b1 = jax.random.normal(k2, (1, 32), jnp.float32) * 0.01
    w2 = jax.random.normal(k3, (32, 64), jnp.float32) * 0.1
    b2 = jax.random.normal(k4, (1, 64), jnp.float32) * 0.01
    w3 = jax.random.normal(k5, (64, num_classes), jnp.float32) * 0.1
    b3 = jax.random.normal(k6, (1, num_classes), jnp.float32) * 0.01
    return w1, b1, w2, b2, w3, b3


def _reference(membership, w1, b1, w2, b2, w3, b3):
    """Original 3-matmul Classifier in plain JAX f32."""
    return ((membership @ w1 + b1) @ w2 + b2) @ w3 + b3


if __name__ == "__main__":
    key = jax.random.PRNGKey(0)

    batch = 8
    codeword_length = 16   # length of a class codeword (rm_aggnet output dim)
    num_classes = 10

    k_in, k_in2, k_params = jax.random.split(key, 3)
    params = init_params(k_params, codeword_length, num_classes)

    # Synthetic membership tensor (what rm_aggnet.forward(x) would produce):
    # values in [0, 1), shape (B, codeword_length).
    membership = jax.random.uniform(k_in, (batch, codeword_length),
                                    dtype=jnp.float32)

    logits = rma_diff_forward(membership, *params)
    jax.block_until_ready(logits)

    ref = _reference(membership, *params)
    assert logits.shape == (batch, num_classes)
    assert jnp.allclose(logits, ref, atol=1e-5, rtol=1e-5), (
        "kernel output deviates from reference")

    # Second check: batch not a multiple of 8 and a multi-tile grid
    # (exercises the padding / tiled-grid path with a tiny block_rows).
    batch2 = 100
    membership2 = jax.random.uniform(k_in2, (batch2, codeword_length),
                                     dtype=jnp.float32)
    logits2 = rma_diff_forward(membership2, *params, block_rows=4)
    jax.block_until_ready(logits2)
    ref2 = _reference(membership2, *params)
    assert logits2.shape == (batch2, num_classes)
    assert jnp.allclose(logits2, ref2, atol=1e-5, rtol=1e-5), (
        "tiled-path kernel output deviates from reference")

    print("KERNEL_OK")
</pallas_src>

<mosaic_0001>
module attributes {stable_mosaic.version = 11 : i64} {
  func.func @rma_diff_kernel(%arg0: i32, %arg1: memref<1x128xf32, #tpu.memory_space<vmem>>, %arg2: memref<128x80xf32, #tpu.memory_space<vmem>>, %arg3: memref<1x80xf32, #tpu.memory_space<vmem>>, %arg4: memref<1x80xf32, #tpu.memory_space<vmem>>) attributes {dimension_semantics = [#tpu.dimension_semantics<parallel>], iteration_bounds = array<i64: 1>, scalar_prefetch = 0 : i64, scratch_operands = 0 : i64, tpu.core_type = #tpu.core_type<tc>, window_params = [{transform_indices = @transform_0, window_bounds = array<i64: 1, 128>}, {pipeline_mode = #tpu.pipeline_mode<synchronous>, transform_indices = @transform_1, window_bounds = array<i64: 128, 80>}, {pipeline_mode = #tpu.pipeline_mode<synchronous>, transform_indices = @transform_2, window_bounds = array<i64: 1, 80>}, {transform_indices = @transform_3, window_bounds = array<i64: 1, 80>}]} {
    %c0 = arith.constant 0 : index
    %c0_0 = arith.constant 0 : index
    %0 = vector.load %arg1[%c0, %c0_0] : memref<1x128xf32, #tpu.memory_space<vmem>>, vector<1x128xf32>
    %c0_1 = arith.constant 0 : index
    %c0_2 = arith.constant 0 : index
    %1 = vector.load %arg2[%c0_1, %c0_2] : memref<128x80xf32, #tpu.memory_space<vmem>>, vector<128x80xf32>
    %cst = arith.constant dense<0.000000e+00> : vector<1x80xf32>
    %2 = tpu.matmul %0, %1, %cst {dimension_numbers = #tpu.dot_dimension_numbers<[1], [0], [0], [1], [0, 0, 1, 1], [], []>} : vector<1x128xf32>, vector<128x80xf32>, vector<1x80xf32> -> vector<1x80xf32>
    %c0_3 = arith.constant 0 : index
    %c0_4 = arith.constant 0 : index
    %3 = vector.load %arg3[%c0_3, %c0_4] : memref<1x80xf32, #tpu.memory_space<vmem>>, vector<1x80xf32>
    %4 = arith.addf %2, %3 : vector<1x80xf32>
    %c0_5 = arith.constant 0 : index
    %c0_6 = arith.constant 0 : index
    %5 = vector.load %arg4[%c0_5, %c0_6] : memref<1x80xf32, #tpu.memory_space<vmem>>, vector<1x80xf32>
    tpu.vector_store %arg4[%c0_5, %c0_6], %4 {strides = array<i32>} : memref<1x80xf32, #tpu.memory_space<vmem>>, vector<1x80xf32>,
    return
  }
  func.func @transform_0(%arg0: i32) -> (i32, i32) {
    %c0_i32 = arith.constant 0 : i32
    %c0_i32_0 = arith.constant 0 : i32
    return %arg0, %c0_i32 : i32, i32
  }
  func.func @transform_1(%arg0: i32) -> (i32, i32) {
    %c0_i32 = arith.constant 0 : i32
    %c0_i32_0 = arith.constant 0 : i32
    %c0_i32_1 = arith.constant 0 : i32
    return %c0_i32, %c0_i32_0 : i32, i32
  }
  func.func @transform_2(%arg0: i32) -> (i32, i32) {
    %c0_i32 = arith.constant 0 : i32
    %c0_i32_0 = arith.constant 0 : i32
    %c0_i32_1 = arith.constant 0 : i32
    return %c0_i32, %c0_i32_0 : i32, i32
  }
  func.func @transform_3(%arg0: i32) -> (i32, i32) {
    %c0_i32 = arith.constant 0 : i32
    %c0_i32_0 = arith.constant 0 : i32
    return %arg0, %c0_i32 : i32, i32
  }
}

</mosaic_0001>

<bundles_post_ra>
// kernel: tpu_custom_call.1
= control target key start
LH: loop header
LB: loop body
LE: loop exit
PB: predicated region body
PF: predicated region fallthrough
CT: control target
= control target key end

     0   :  { %v223_v3 = vmov 0.0|0.0   ;;  %vm224_vm0 = vmmov 0   ;;  %v225_v6 = vmov 0.0   ;;  %s313_s0 = inlined_call_operand.vmem [shape: f32[1,128], index: 0, kind: input, shape index: {}]   ;;  %s314_s1 = inlined_call_operand.vmem [shape: f32[128,80], index: 1, kind: input, shape index: {}]   ;;  %s315_s2 = inlined_call_operand.vmem [shape: f32[1,80], index: 2, kind: input, shape index: {}]   ;;  %s316_s3 = inlined_call_operand.hbm [shape: f32[1,80], index: 3, kind: output, shape index: {}]  }
   0x1   :  { %v16_v0 = vld [vmem:[%s314_s1] sm:$0xff]  ;;  %v17_v1 = vld [vmem:[%s314_s1 + $0x8] sm:$0xff]  ;;  %v18_v2 = vld [vmem:[%s314_s1 + $0x10] sm:$0xff]  ;;  %171 = vmatprep.subr.bf16.mxu0 %v223_v3  ;;  %168 = vmatprep.mubr.msk.f32.mxu0 %vm224_vm0, %v225_v6 }
   0x2   :  { %v172_v4 = vpack.c.bf16 %v17_v1, %v16_v0  ;;  %v19_v5 = vld [vmem:[%s314_s1 + $0x18] sm:$0xff]  ;;  %v20_v8 = vld [vmem:[%s314_s1 + $0x20] sm:$0xff]  ;;  %v21_v9 = vld [vmem:[%s314_s1 + $0x28] sm:$0xff] }
   0x3   :  { %v175_v7 = vpack.c.bf16 %v19_v5, %v18_v2 }
   0x4   :  { %173 = vmatpush3.bf16.msra.mxu0 %v172_v4 }
   0x5   :  { %174 = vmatprep.subr.bf16.mxu0 %v223_v3 }
   0x6   :  { %8 = vsyncpa [#allocation3], 0  ;;  %v178_v10 = vpack.c.bf16 %v21_v9, %v20_v8  ;;  %v22_v11 = vld [vmem:[%s314_s1 + $0x30] sm:$0xff]  ;;  %v23_v12 = vld [vmem:[%s314_s1 + $0x38] sm:$0xff]  ;;  %s226_s21 = smov [#allocation2]   ;;  %vm103_vm1 = vcmask 647168  }
   0x7   :  { %v181_v13 = vpack.c.bf16 %v23_v12, %v22_v11  ;;  %v24_v14 = vld [vmem:[%s314_s1 + $0x40] sm:$0xff]  ;;  %v25_v15 = vld [vmem:[%s314_s1 + $0x48] sm:$0xff]  ;;  %v26_v17 = vld [vmem:[%s314_s1 + $0x50] sm:$0xff]  ;;  %s111_s22 = sshll.u32 %s226_s21, 4  ;;  %s112_s22 = int_to_ptr.vmem [resolvable:$true] %s111_s22 }
   0x8   :  { %176 = vmatpush3.bf16.msra.mxu0 %v175_v7  ;;  %v184_v16 = vpack.c.bf16 %v25_v15, %v24_v14  ;;  %v27_v18 = vld [vmem:[%s314_s1 + $0x58] sm:$0xff]  ;;  %v28_v20 = vld [vmem:[%s314_s1 + $0x60] sm:$0xff]  ;;  %v29_v21 = vld [vmem:[%s314_s1 + $0x68] sm:$0xff]  ;;  %s203_s23 = scalar_lea.vmem %s112_s22, 32  ;;  %p204_p1 = scmp.lt.s32.totalorder %s112_s22, %s112_s22 }
   0x9   :  { %177 = vmatprep.subr.bf16.mxu0 %v223_v3  ;;  %v187_v19 = vpack.c.bf16 %v27_v18, %v26_v17  ;;  %v190_v22 = vpack.c.bf16 %v29_v21, %v28_v20  ;;  %v30_v23 = vld [vmem:[%s314_s1 + $0x70] sm:$0xff]  ;;  %v31_v24 = vld [vmem:[%s314_s1 + $0x78] sm:$0xff]  ;;  %v15_v26 = vld [vmem:[%s313_s0] sm:$0x1]  ;;  %s199_s1 = scalar_lea.vmem %s112_s22, 16 }
   0xa   :  { %v193_v25 = vpack.c.bf16 %v31_v24, %v30_v23  ;;  %v32_v27 = vld [vmem:[%s315_s2] sm:$0x1]  ;;  %p200_p0 = scmp.ne.s32.totalorder %s112_s22, %s199_s1  ;;  %p205_p2 = scmp.lt.s32.totalorder %s203_s23, %s199_s1 }
   0xc   :  { %179 = vmatpush3.bf16.msra.mxu0 %v178_v10  ;;  %p206_p3 = por %p205_p2, %p204_p1 }
   0xd   :  { %180 = vmatprep.subr.bf16.mxu0 %v223_v3 }
   0xe   :  { %p207_p4 = pnand %p206_p3, %p200_p0 }
  0x10   :  { %182 = vmatpush3.bf16.msra.mxu0 %v181_v13 }
  0x11   :  { %183 = vmatprep.subr.bf16.mxu0 %v223_v3 }
  0x14   :  { %185 = vmatpush3.bf16.msra.mxu0 %v184_v16 }
  0x15   :  { %186 = vmatprep.subr.bf16.mxu0 %v223_v3 }
  0x18   :  { %188 = vmatpush3.bf16.msra.mxu0 %v187_v19 }
  0x19   :  { %189 = vmatprep.subr.bf16.mxu0 %v223_v3 }
  0x1c   :  { %191 = vmatpush3.bf16.msra.mxu0 %v190_v22 }
  0x1d   :  { %192 = vmatprep.subr.bf16.mxu0 %v223_v3 }
  0x20   :  { %194 = vmatpush3.bf16.msra.mxu0 %v193_v25 }
  0x23   :  { %169 = vmatmul.mubr.f32.vlgmr.msra.gmra.mrb[0].mxu0 %v15_v26 }
  0xf6   :  { %v99_v28 = vpop.f32.mrb[0].mxu0 }
  0xf7   :  { %v100_v29 = vadd.f32 %v99_v28, %v32_v27  ;;  %v170_v30 = vpop.f32.mrb[1].mxu0 }
  0xf9   :  { %104 = vst.msk [vmem:[#allocation2] sm:$0x1] %vm103_vm1, %v100_v29 }
  0xfa   :  { %210 = shalt.err (!%p207_p4)
}
  0xfb   :  { %s211_s2 = scalar_lea.hbm %s316_s3, 16 }
  0xfc   :  { %p212_p5 = scmp.ne.s32.totalorder %s316_s3, %s211_s2  ;;  %p215_p6 = scmp.lt.u32.totalorder %s211_s2, %s316_s3 }
  0xfe   :  { %p217_p7 = pnand %p215_p6, %p212_p5 }
 0x100   :  { %220 = shalt.err (!%p217_p7)
}
 0x101   :  { %114 = dma.vmem_to_hbm [thread:$0]  %s112_s22, 16, %s316_s3, [#allocation3]  }
 0x102   :  { %221 = dma.done.wait [#allocation3], 16  }
 0x103   :  { %222 = vsyncadd [#allocation3], 4294967280 }
 0x104   :  { %118 = vsyncpa [#allocation3], 1 }

</bundles_post_ra>
